<compile_context>
chip_gen: v7x
topology: tpu7x:2x2x1
jax: 0.10.0
libtpu: 0.0.40
codegen_flags: <defaults>
</compile_context>

<pallas_src>
import functools

import numpy as np
import jax
import jax.numpy as jnp
from jax.experimental import pallas as pl
from jax.experimental.pallas import tpu as pltpu


def _round_up(a, b):
    return -(-a // b) * b


def _ten_hot_kernel(x_ref, o_ref, *, feat_dim, weights, tv, tiled_v):
    # x_ref: (BR, K) int32 token indices for this block of rows
    # o_ref: (BR, TV) float32 weighted multi-hot output tile
    br, v = o_ref.shape
    # lane = local token id within this V tile (recomputed per step; see header note)
    tok_ids = jax.lax.broadcasted_iota(jnp.int32, (br, v), 1)
    xv = x_ref[...]                                        # (BR, K)
    if tiled_v:
        # shift indices into this V tile's local coordinate frame (single tiny op)
        xv = xv - pl.program_id(1) * tv

    if feat_dim == 0:
        o_ref[...] = jnp.zeros((br, v), jnp.float32)
        return

    # k = 0: fold the zero-init into the first select (no separate zeros splat)
    idx = xv[:, 0].reshape(br, 1)                          # (BR, 1)
    out = jnp.where(tok_ids == idx, jnp.float32(weights[0]), jnp.float32(0.0))
    # K is small & static -> unrolled elementwise select chain; last write wins
    for k in range(1, feat_dim):
        idx = xv[:, k].reshape(br, 1)
        out = jnp.where(tok_ids == idx, jnp.float32(weights[k]), out)
    o_ref[...] = out


# ---------------------------------------------------------------------------
_V_FULL_MAX = 8192       # up to this vocab size: one full-width (unpadded) V block
_V_TILE = 2048           # V tile width for very large vocabularies
_MAX_BLOCK_ROWS = 4096   # row-tile cap
_TILE_BYTES = 4 << 20    # ~4 MiB output tile => ~8 MiB double-buffered (fits all gens)


def weighted_ten_hot_encode(x, num_tokens):
    """JAX/Pallas equivalent of WeightedTenHotEncodeLayer.forward."""
    assert x.ndim in (2, 3)
    lead_shape = x.shape[:-1]
    k = x.shape[-1]
    r = int(np.prod(lead_shape)) if lead_shape else 1
    x_flat = x.reshape(r, k).astype(jnp.int32)

    # ---- V (vocab) tiling ---------------------------------------------------
    if num_tokens <= _V_FULL_MAX:
        tv = num_tokens            # full-dim block: no 128-pad, no post-slice on V
        v_pad = num_tokens
    else:
        tv = _V_TILE               # multiple of 128; second parallel grid axis
        v_pad = _round_up(num_tokens, tv)
    n_v = v_pad // tv
    tiled_v = n_v > 1

    # ---- row tiling (VMEM-budgeted, don't over-pad small inputs) -------------
    rows_by_vmem = max(8, (_TILE_BYTES // (max(tv, 1) * 4)) // 8 * 8)
    block_rows = max(8, min(_MAX_BLOCK_ROWS, rows_by_vmem, _round_up(r, 8)))
    r_pad = _round_up(r, block_rows)
    if r_pad != r:
        x_flat = jnp.pad(x_flat, ((0, r_pad - r), (0, 0)))

    # Exact weights of the reference: repeated subtraction in Python/double,
    # cast to float32 at use-site (matches torch storing into a float32 tensor).
    weights = []
    w = 1.0
    for _ in range(k):
        weights.append(w)
        w -= 0.1
    weights = tuple(weights)

    kernel = functools.partial(
        _ten_hot_kernel, feat_dim=k, weights=weights, tv=tv, tiled_v=tiled_v)

    out = pl.pallas_call(
        kernel,
        out_shape=jax.ShapeDtypeStruct((r_pad, v_pad), jnp.float32),
        grid=(r_pad // block_rows, n_v),
        in_specs=[pl.BlockSpec((block_rows, k), lambda i, j: (i, 0))],
        out_specs=pl.BlockSpec((block_rows, tv), lambda i, j: (i, j)),
        compiler_params=pltpu.CompilerParams(
            dimension_semantics=("parallel", "parallel")),
    )(x_flat)

    # Slice only when padding actually happened (avoids an extra full HBM copy
    # in the common case).
    if r_pad != r or v_pad != num_tokens:
        out = out[:r, :num_tokens]
    return out.reshape(*lead_shape, num_tokens)


def _reference(x, num_tokens):
    """Pure-numpy replica of the PyTorch forward (for verification)."""
    x = np.asarray(x)
    k = x.shape[-1]
    flat_x = x.reshape(-1, k)
    flat_out = np.zeros((flat_x.shape[0], num_tokens), np.float32)
    for n in range(flat_x.shape[0]):
        w = 1.0
        for f in flat_x[n]:
            flat_out[n, int(f)] = w
            w -= 0.1
    return flat_out.reshape(*x.shape[:-1], num_tokens)


if __name__ == "__main__":
    num_tokens = 100   # module hyper-parameter (no learned weights in __init__)
    key = jax.random.PRNGKey(0)
    k2d, k3d = jax.random.split(key)

    # 2-D case: (N, K) = (8, 10)  ("ten-hot": 10 features per row)
    x2d = jax.random.randint(k2d, (8, 10), 0, num_tokens, dtype=jnp.int32)
    # 3-D case: (N, T, K) = (2, 6, 10)
    x3d = jax.random.randint(k3d, (2, 6, 10), 0, num_tokens, dtype=jnp.int32)

    out2d = jax.block_until_ready(weighted_ten_hot_encode(x2d, num_tokens))
    out3d = jax.block_until_ready(weighted_ten_hot_encode(x3d, num_tokens))

    np.testing.assert_allclose(np.asarray(out2d),
                               _reference(np.asarray(x2d), num_tokens),
                               rtol=0, atol=1e-6)
    np.testing.assert_allclose(np.asarray(out3d),
                               _reference(np.asarray(x3d), num_tokens),
                               rtol=0, atol=1e-6)
    assert out2d.shape == (8, num_tokens) and out2d.dtype == jnp.float32
    assert out3d.shape == (2, 6, num_tokens) and out3d.dtype == jnp.float32

    print("KERNEL_OK")
</pallas_src>

<mosaic_0001>
module attributes {stable_mosaic.version = 11 : i64} {
  func.func @_ten_hot_kernel(%arg0: i32, %arg1: i32, %arg2: memref<8x10xi32, #tpu.memory_space<vmem>>, %arg3: memref<8x100xf32, #tpu.memory_space<vmem>>) attributes {dimension_semantics = [#tpu.dimension_semantics<parallel>, #tpu.dimension_semantics<parallel>], iteration_bounds = array<i64: 1, 1>, scalar_prefetch = 0 : i64, scratch_operands = 0 : i64, tpu.core_type = #tpu.core_type<tc>, window_params = [{transform_indices = @transform_0, window_bounds = array<i64: 8, 10>}, {transform_indices = @transform_1, window_bounds = array<i64: 8, 100>}]} {
    %0 = tpu.iota {dimensions = array<i32: 1>} : vector<8x100xi32>
    %c0 = arith.constant 0 : index
    %c0_0 = arith.constant 0 : index
    %1 = vector.load %arg2[%c0, %c0_0] : memref<8x10xi32, #tpu.memory_space<vmem>>, vector<8x10xi32>
    %2 = vector.extract_strided_slice %1 {offsets = [0, 0], sizes = [8, 1], strides = [1, 1]} : vector<8x10xi32> to vector<8x1xi32>
    %3 = vector.shape_cast %2 : vector<8x1xi32> to vector<8xi32>
    %4 = vector.shape_cast %3 : vector<8xi32> to vector<8x1xi32>
    %5 = vector.broadcast %4 : vector<8x1xi32> to vector<8x100xi32>
    %6 = arith.cmpi eq, %0, %5 : vector<8x100xi32>
    %cst = arith.constant 1.000000e+00 : f32
    %cst_1 = arith.constant 0.000000e+00 : f32
    %7 = vector.broadcast %cst : f32 to vector<8x100xf32>
    %8 = vector.broadcast %cst_1 : f32 to vector<8x100xf32>
    %9 = arith.select %6, %7, %8 : vector<8x100xi1>, vector<8x100xf32>
    %10 = vector.extract_strided_slice %1 {offsets = [0, 1], sizes = [8, 1], strides = [1, 1]} : vector<8x10xi32> to vector<8x1xi32>
    %11 = vector.shape_cast %10 : vector<8x1xi32> to vector<8xi32>
    %12 = vector.shape_cast %11 : vector<8xi32> to vector<8x1xi32>
    %13 = vector.broadcast %12 : vector<8x1xi32> to vector<8x100xi32>
    %14 = arith.cmpi eq, %0, %13 : vector<8x100xi32>
    %cst_2 = arith.constant 0.899999976 : f32
    %15 = vector.broadcast %cst_2 : f32 to vector<8x100xf32>
    %16 = arith.select %14, %15, %9 : vector<8x100xi1>, vector<8x100xf32>
    %17 = vector.extract_strided_slice %1 {offsets = [0, 2], sizes = [8, 1], strides = [1, 1]} : vector<8x10xi32> to vector<8x1xi32>
    %18 = vector.shape_cast %17 : vector<8x1xi32> to vector<8xi32>
    %19 = vector.shape_cast %18 : vector<8xi32> to vector<8x1xi32>
    %20 = vector.broadcast %19 : vector<8x1xi32> to vector<8x100xi32>
    %21 = arith.cmpi eq, %0, %20 : vector<8x100xi32>
    %cst_3 = arith.constant 8.000000e-01 : f32
    %22 = vector.broadcast %cst_3 : f32 to vector<8x100xf32>
    %23 = arith.select %21, %22, %16 : vector<8x100xi1>, vector<8x100xf32>
    %24 = vector.extract_strided_slice %1 {offsets = [0, 3], sizes = [8, 1], strides = [1, 1]} : vector<8x10xi32> to vector<8x1xi32>
    %25 = vector.shape_cast %24 : vector<8x1xi32> to vector<8xi32>
    %26 = vector.shape_cast %25 : vector<8xi32> to vector<8x1xi32>
    %27 = vector.broadcast %26 : vector<8x1xi32> to vector<8x100xi32>
    %28 = arith.cmpi eq, %0, %27 : vector<8x100xi32>
    %cst_4 = arith.constant 0.699999988 : f32
    %29 = vector.broadcast %cst_4 : f32 to vector<8x100xf32>
    %30 = arith.select %28, %29, %23 : vector<8x100xi1>, vector<8x100xf32>
    %31 = vector.extract_strided_slice %1 {offsets = [0, 4], sizes = [8, 1], strides = [1, 1]} : vector<8x10xi32> to vector<8x1xi32>
    %32 = vector.shape_cast %31 : vector<8x1xi32> to vector<8xi32>
    %33 = vector.shape_cast %32 : vector<8xi32> to vector<8x1xi32>
    %34 = vector.broadcast %33 : vector<8x1xi32> to vector<8x100xi32>
    %35 = arith.cmpi eq, %0, %34 : vector<8x100xi32>
    %cst_5 = arith.constant 6.000000e-01 : f32
    %36 = vector.broadcast %cst_5 : f32 to vector<8x100xf32>
    %37 = arith.select %35, %36, %30 : vector<8x100xi1>, vector<8x100xf32>
    %38 = vector.extract_strided_slice %1 {offsets = [0, 5], sizes = [8, 1], strides = [1, 1]} : vector<8x10xi32> to vector<8x1xi32>
    %39 = vector.shape_cast %38 : vector<8x1xi32> to vector<8xi32>
    %40 = vector.shape_cast %39 : vector<8xi32> to vector<8x1xi32>
    %41 = vector.broadcast %40 : vector<8x1xi32> to vector<8x100xi32>
    %42 = arith.cmpi eq, %0, %41 : vector<8x100xi32>
    %cst_6 = arith.constant 5.000000e-01 : f32
    %43 = vector.broadcast %cst_6 : f32 to vector<8x100xf32>
    %44 = arith.select %42, %43, %37 : vector<8x100xi1>, vector<8x100xf32>
    %45 = vector.extract_strided_slice %1 {offsets = [0, 6], sizes = [8, 1], strides = [1, 1]} : vector<8x10xi32> to vector<8x1xi32>
    %46 = vector.shape_cast %45 : vector<8x1xi32> to vector<8xi32>
    %47 = vector.shape_cast %46 : vector<8xi32> to vector<8x1xi32>
    %48 = vector.broadcast %47 : vector<8x1xi32> to vector<8x100xi32>
    %49 = arith.cmpi eq, %0, %48 : vector<8x100xi32>
    %cst_7 = arith.constant 4.000000e-01 : f32
    %50 = vector.broadcast %cst_7 : f32 to vector<8x100xf32>
    %51 = arith.select %49, %50, %44 : vector<8x100xi1>, vector<8x100xf32>
    %52 = vector.extract_strided_slice %1 {offsets = [0, 7], sizes = [8, 1], strides = [1, 1]} : vector<8x10xi32> to vector<8x1xi32>
    %53 = vector.shape_cast %52 : vector<8x1xi32> to vector<8xi32>
    %54 = vector.shape_cast %53 : vector<8xi32> to vector<8x1xi32>
    %55 = vector.broadcast %54 : vector<8x1xi32> to vector<8x100xi32>
    %56 = arith.cmpi eq, %0, %55 : vector<8x100xi32>
    %cst_8 = arith.constant 3.000000e-01 : f32
    %57 = vector.broadcast %cst_8 : f32 to vector<8x100xf32>
    %58 = arith.select %56, %57, %51 : vector<8x100xi1>, vector<8x100xf32>
    %59 = vector.extract_strided_slice %1 {offsets = [0, 8], sizes = [8, 1], strides = [1, 1]} : vector<8x10xi32> to vector<8x1xi32>
    %60 = vector.shape_cast %59 : vector<8x1xi32> to vector<8xi32>
    %61 = vector.shape_cast %60 : vector<8xi32> to vector<8x1xi32>
    %62 = vector.broadcast %61 : vector<8x1xi32> to vector<8x100xi32>
    %63 = arith.cmpi eq, %0, %62 : vector<8x100xi32>
    %cst_9 = arith.constant 2.000000e-01 : f32
    %64 = vector.broadcast %cst_9 : f32 to vector<8x100xf32>
    %65 = arith.select %63, %64, %58 : vector<8x100xi1>, vector<8x100xf32>
    %66 = vector.extract_strided_slice %1 {offsets = [0, 9], sizes = [8, 1], strides = [1, 1]} : vector<8x10xi32> to vector<8x1xi32>
    %67 = vector.shape_cast %66 : vector<8x1xi32> to vector<8xi32>
    %68 = vector.shape_cast %67 : vector<8xi32> to vector<8x1xi32>
    %69 = vector.broadcast %68 : vector<8x1xi32> to vector<8x100xi32>
    %70 = arith.cmpi eq, %0, %69 : vector<8x100xi32>
    %cst_10 = arith.constant 1.000000e-01 : f32
    %71 = vector.broadcast %cst_10 : f32 to vector<8x100xf32>
    %72 = arith.select %70, %71, %65 : vector<8x100xi1>, vector<8x100xf32>
    %c0_11 = arith.constant 0 : index
    %c0_12 = arith.constant 0 : index
    %73 = vector.load %arg3[%c0_11, %c0_12] : memref<8x100xf32, #tpu.memory_space<vmem>>, vector<8x100xf32>
    tpu.vector_store %arg3[%c0_11, %c0_12], %72 {strides = array<i32>} : memref<8x100xf32, #tpu.memory_space<vmem>>, vector<8x100xf32>,
    return
  }
  func.func @transform_0(%arg0: i32, %arg1: i32) -> (i32, i32) {
    %c0_i32 = arith.constant 0 : i32
    %c0_i32_0 = arith.constant 0 : i32
    return %arg0, %c0_i32 : i32, i32
  }
  func.func @transform_1(%arg0: i32, %arg1: i32) -> (i32, i32) {
    %c0_i32 = arith.constant 0 : i32
    return %arg0, %arg1 : i32, i32
  }
}

</mosaic_0001>

<bundles_post_ra>
// kernel: tpu_custom_call.1
= control target key start
LH: loop header
LB: loop body
LE: loop exit
PB: predicated region body
PF: predicated region fallthrough
CT: control target
= control target key end

     0   :  { %6 = vsyncpa [#allocation3], 0  ;;  %s210_s0 = inlined_call_operand.hbm [shape: s32[8,10], index: 0, kind: input, shape index: {}]   ;;  %s211_s1 = inlined_call_operand.hbm [shape: f32[8,100], index: 1, kind: output, shape index: {}]  }
   0x1   :  { %7 = vsyncpa [#allocation4], 0  ;;  %s163_s6 = smov [#allocation2]   ;;  %s115_s10 = scalar_lea.hbm %s210_s0, 128 }
   0x2   :  { %s14_s7 = sshll.u32 %s163_s6, 4  ;;  %p116_p0 = scmp.ne.s32.totalorder %s210_s0, %s115_s10  ;;  %s15_s7 = int_to_ptr.vmem [resolvable:$true] %s14_s7 }
   0x3   :  { %p119_p1 = scmp.lt.u32.totalorder %s115_s10, %s210_s0 }
   0x5   :  { %p121_p2 = pnand %p119_p1, %p116_p0 }
   0x7   :  { %124 = shalt.err (!%p121_p2)
}
   0x8   :  { %s125_s15 = scalar_lea.vmem %s15_s7, 128  ;;  %p130_p4 = scmp.lt.s32.totalorder %s15_s7, %s15_s7 }
   0x9   :  { %p126_p3 = scmp.ne.s32.totalorder %s15_s7, %s125_s15  ;;  %p131_p5 = scmp.lt.s32.totalorder %s125_s15, %s125_s15 }
   0xb   :  { %p132_p6 = por %p131_p5, %p130_p4 }
   0xd   :  { %p133_p7 = pnand %p132_p6, %p126_p3 }
   0xf   :  { %136 = shalt.err (!%p133_p7)
}
  0x10   :  { %17 = dma.hbm_to_vmem [thread:$0]  %s210_s0, 128, %s15_s7, [#allocation3]  }
  0x11   :  { %159 = dma.done.wait [#allocation3], 128  }
  0x12   :  { %160 = vsyncadd [#allocation3], 4294967168  ;;  %v164_v0 = vmov 2   ;;  %v165_v1 = vmov 0   ;;  %v23_v2 = vld [vmem:[#allocation2] sm:$0xff]  ;;  %v166_v3 = vmov 3   ;;  %v21_v11 = vlaneseq }
  0x13   :  { %106 = vset.pattern.permute.xlu1 %v164_v0  ;;  %104 = vset.pattern.permute.xlu0 %v165_v1  ;;  %v167_v4 = vmov 1   ;;  %v168_v5 = vmov 4   ;;  %v169_v6 = vmov 5   ;;  %v170_v7 = vmov 6   ;;  %s175_s0 = smov [#allocation5]  }
  0x14   :  { %35 = vperm.xlu1 %106, %v23_v2   ;;  %25 = vperm.xlu0 %104, %v23_v2   ;;  %v171_v8 = vmov 8   ;;  %v172_v9 = vmov 7   ;;  %v173_v10 = vmov 9   ;;  %v22_v14 = vand.u32 127, %v21_v11  ;;  %s82_s18 = sshll.u32 %s175_s0, 4  ;;  %s83_s18 = int_to_ptr.vmem [resolvable:$true] %s82_s18 }
  0x15   :  { %v174_v17 = vmov 0.0   ;;  %vm74_vm9 = vcmask 818176   ;;  %s137_s19 = scalar_lea.vmem %s83_s18, 128  ;;  %p142_p9 = scmp.lt.s32.totalorder %s83_s18, %s83_s18 }
  0x16   :  { %p138_p8 = scmp.ne.s32.totalorder %s83_s18, %s137_s19  ;;  %p143_p10 = scmp.lt.s32.totalorder %s137_s19, %s137_s19 }
  0x18   :  { %107 = vset.pattern.permute.xlu1 %v166_v3  ;;  %105 = vset.pattern.permute.xlu0 %v167_v4  ;;  %p144_p11 = por %p143_p10, %p142_p9 }
  0x19   :  { %40 = vperm.xlu1 %107, %v23_v2   ;;  %30 = vperm.xlu0 %105, %v23_v2  }
  0x1a   :  { %p145_p12 = pnand %p144_p11, %p138_p8 }
  0x1d   :  { %108 = vset.pattern.permute.xlu1 %v168_v5  ;;  %109 = vset.pattern.permute.xlu0 %v169_v6 }
  0x1e   :  { %45 = vperm.xlu1 %108, %v23_v2   ;;  %50 = vperm.xlu0 %109, %v23_v2  }
  0x22   :  { %110 = vset.pattern.permute.xlu1 %v170_v7  ;;  %112 = vset.pattern.permute.xlu0 %v171_v8 }
  0x23   :  { %55 = vperm.xlu1 %110, %v23_v2   ;;  %65 = vperm.xlu0 %112, %v23_v2  }
  0x27   :  { %111 = vset.pattern.permute.xlu1 %v172_v9  ;;  %114 = vset.pattern.permute.xlu0 %v173_v10 }
  0x28   :  { %60 = vperm.xlu1 %111, %v23_v2  }
  0x2c   :  { %113 = vset.pattern.permute.xlu1 %v173_v10 }
  0x2d   :  { %70 = vperm.xlu1 %113, %v23_v2  }
  0x93   :  { %v36_v12 = vpop.permute.xlu1 %35  ;;  %v26_v13 = vpop.permute.xlu0 %25 }
  0x94   :  { %vm27_vm0 = vcmp.eq.s32.totalorder %v22_v14, %v26_v13  ;;  %vm37_vm2 = vcmp.eq.s32.totalorder %v22_v14, %v36_v12 }
  0x95   :  { %v28_v18 = vsel %vm27_vm0, 1.0, %v174_v17 }
  0x98   :  { %v41_v15 = vpop.permute.xlu1 %40  ;;  %v31_v16 = vpop.permute.xlu0 %30 }
  0x99   :  { %vm32_vm1 = vcmp.eq.s32.totalorder %v22_v14, %v31_v16  ;;  %vm42_vm4 = vcmp.eq.s32.totalorder %v22_v14, %v41_v15 }
  0x9a   :  { %v33_v20 = vsel %vm32_vm1, 0.9, %v28_v18 }
  0x9b   :  { %v38_v21 = vsel %vm37_vm2, 0.8, %v33_v20 }
  0x9c   :  { %v43_v24 = vsel %vm42_vm4, 0.7, %v38_v21 }
  0x9d   :  { %v46_v19 = vpop.permute.xlu1 %45  ;;  %v51_v22 = vpop.permute.xlu0 %50 }
  0x9e   :  { %vm47_vm3 = vcmp.eq.s32.totalorder %v22_v14, %v46_v19  ;;  %vm52_vm5 = vcmp.eq.s32.totalorder %v22_v14, %v51_v22 }
  0x9f   :  { %v48_v25 = vsel %vm47_vm3, 0.6, %v43_v24 }
  0xa0   :  { %v53_v28 = vsel %vm52_vm5, 0.5, %v48_v25 }
  0xa2   :  { %v56_v23 = vpop.permute.xlu1 %55  ;;  %v66_v27 = vpop.permute.xlu0 %65 }
  0xa3   :  { %vm57_vm6 = vcmp.eq.s32.totalorder %v22_v14, %v56_v23  ;;  %vm67_vm8 = vcmp.eq.s32.totalorder %v22_v14, %v66_v27 }
  0xa4   :  { %v58_v29 = vsel %vm57_vm6, 0.4, %v53_v28 }
  0xa7   :  { %v61_v26 = vpop.permute.xlu1 %60 }
  0xa8   :  { %vm62_vm7 = vcmp.eq.s32.totalorder %v22_v14, %v61_v26 }
  0xa9   :  { %v63_v30 = vsel %vm62_vm7, 0.3, %v58_v29 }
  0xaa   :  { %v68_v32 = vsel %vm67_vm8, 0.2, %v63_v30 }
  0xac   :  { %v71_v31 = vpop.permute.xlu1 %70 }
  0xad   :  { %vm72_vm10 = vcmp.eq.s32.totalorder %v22_v14, %v71_v31 }
  0xae   :  { %v73_v33 = vsel %vm72_vm10, 0.1, %v68_v32 }
  0xaf   :  { %75 = vst.msk [vmem:[#allocation5] sm:$0xff] %vm74_vm9, %v73_v33 }
  0xb0   :  { %148 = shalt.err (!%p145_p12)
}
  0xb1   :  { %s149_s22 = scalar_lea.hbm %s211_s1, 128 }
  0xb2   :  { %p150_p13 = scmp.ne.s32.totalorder %s211_s1, %s149_s22  ;;  %p153_p0 = scmp.lt.u32.totalorder %s149_s22, %s211_s1 }
  0xb4   :  { %p155_p1 = pnand %p153_p0, %p150_p13 }
  0xb6   :  { %158 = shalt.err (!%p155_p1)
}
  0xb7   :  { %85 = dma.vmem_to_hbm [thread:$0]  %s83_s18, 128, %s211_s1, [#allocation4]  }
  0xb8   :  { %161 = dma.done.wait [#allocation4], 128  }
  0xb9   :  { %162 = vsyncadd [#allocation4], 4294967168 }
  0xba   :  { %89 = vsyncpa [#allocation3], 1 }
  0xbb   :  { %90 = vsyncpa [#allocation4], 1 }

</bundles_post_ra>
